<compile_context>
chip_gen: v5e
topology: v5e:2x2
jax: 0.10.0
libtpu: 0.0.40
codegen_flags: <defaults>
</compile_context>

<pallas_src>
import jax
import jax.numpy as jnp
from jax.experimental import pallas as pl
from jax.experimental.pallas import tpu as pltpu

# -------------------- configuration (matches module defaults) ---------------
POOL_SIZE = 8
PROMPT_LENGTH = 4
EMBED_DIM = 32
TOP_K = 5
BATCHWISE_PROMPT = True  # only the default (batchwise) path is implemented
EPS = 1e-12              # F.normalize eps


# -------------------- fused kernel ------------------------------------------
def _prompt_pool_kernel(q_ref, params_ref, sel_ref, sim_ref):
    """Fused L2-normalize + cosine sim + batch-mean rank top-k + prompt gather.

    q_ref      : [B, D]        query
    params_ref : [D+P, L*D]    rows 0:D   = prompt_key^T (lanes 0:P valid)
                               rows D:D+P = prompt pool, lane-dense rows
    sel_ref    : [P, L*D]      prompts sorted by descending avg similarity
    sim_ref    : [B, P]        cosine similarity (module output)
    """
    B, D = q_ref.shape
    P, LD = sel_ref.shape

    q = q_ref[...]                              # [B, D]  f32
    k_t = params_ref[0:D, 0:P]                  # [D, P]  keys (transposed)
    pool = params_ref[D:D + P, :]               # [P, LD] lane-dense pool rows

    # --- L2 normalization: x * rsqrt(max(||x||^2, eps^2)) == x / max(||x||, eps)
    q_n = q * jax.lax.rsqrt(
        jnp.maximum(jnp.sum(q * q, axis=1, keepdims=True), EPS * EPS))
    k_n_t = k_t * jax.lax.rsqrt(
        jnp.maximum(jnp.sum(k_t * k_t, axis=0, keepdims=True), EPS * EPS))

    # --- cosine similarity [B, P]; standard (non-transposed) MXU contraction.
    sim = jnp.dot(q_n, k_n_t, precision=jax.lax.Precision.HIGHEST,
                  preferred_element_type=jnp.float32)
    sim_ref[...] = sim

    # --- batch-mean similarity, row orientation [1, P] (one sublane reduce).
    avg_row = jnp.mean(sim, axis=0, keepdims=True)

    row_ids = jax.lax.broadcasted_iota(jnp.int32, (P, P), 0)
    col_ids = jax.lax.broadcasted_iota(jnp.int32, (P, P), 1)

    # Exact in-vreg "transpose" of avg: select the diagonal, lane-reduce.
    # avg_col[j, 0] == avg_row[0, j] bit-exactly (single nonzero term per row).
    avg_col = jnp.sum(jnp.where(row_ids == col_ids, avg_row, 0.0),
                      axis=1, keepdims=True)                    # [P, 1]

    # --- rank-based top-k: beats[j, i] = prompt j outranks prompt i
    #     (higher avg similarity, ties broken by lower index == torch.topk).
    beats = (avg_col > avg_row) | ((avg_col == avg_row) & (row_ids < col_ids))
    rank = jnp.sum(beats.astype(jnp.float32), axis=0, keepdims=True)  # [1, P]

    # --- permutation one-hot [k, i] = (rank[i] == k) and ONE MXU gather:
    #     row k of sel = pool row whose rank is k (rows 0..top_k-1 = top-k).
    onehot = (row_ids.astype(jnp.float32) == rank).astype(jnp.float32)  # [P, P]
    sel = jnp.dot(onehot, pool, precision=jax.lax.Precision.HIGHEST,
                  preferred_element_type=jnp.float32)            # [P, LD]
    sel_ref[...] = sel.astype(sel_ref.dtype)                     # one full-tile store


# -------------------- parameter packing (done once, outside the hot path) ----
def pack_prompt_params(prompt_pool, prompt_key):
    """Pack keys (transposed, lane-padded) + lane-dense pool into one operand."""
    P, L, D = prompt_pool.shape
    LD = L * D
    pool_2d = prompt_pool.reshape(P, LD).astype(jnp.float32)      # [P, LD]
    key_t = jnp.zeros((D, LD), jnp.float32).at[:, :P].set(
        prompt_key.astype(jnp.float32).T)                         # [D, LD]
    return jnp.concatenate([key_t, pool_2d], axis=0)              # [D+P, LD]


# -------------------- wrapper: full forward pass -----------------------------
def prompt_pool_forward(query, packed_params, *, pool_size=POOL_SIZE,
                        prompt_length=PROMPT_LENGTH, embed_dim=EMBED_DIM,
                        top_k=TOP_K, batchwise_prompt=BATCHWISE_PROMPT):
    """Returns (selected_prompts, prompt_mask, similarity)."""
    B, D = query.shape
    P, L = pool_size, prompt_length
    LD = L * embed_dim
    assert D == embed_dim
    assert packed_params.shape == (D + P, LD)

    if not batchwise_prompt:
        # TODO(synk): per-sample (non-batchwise) top-k selection path not
        # implemented (module default is batchwise_prompt=True).
        raise NotImplementedError("only batchwise_prompt=True is implemented")

    sel_full, similarity = pl.pallas_call(
        _prompt_pool_kernel,
        out_shape=(
            jax.ShapeDtypeStruct((P, LD), packed_params.dtype),   # full (8,128) tile
            jax.ShapeDtypeStruct((B, P), jnp.float32),
        ),
        # Gridless, whole-array-in-VMEM call: total working set is a few KiB,
        # so this is the minimal-overhead form on all generations.
        in_specs=[
            pl.BlockSpec(memory_space=pltpu.MemorySpace.VMEM),    # query
            pl.BlockSpec(memory_space=pltpu.MemorySpace.VMEM),    # packed params
        ],
        out_specs=(
            pl.BlockSpec(memory_space=pltpu.MemorySpace.VMEM),    # sorted prompts
            pl.BlockSpec(memory_space=pltpu.MemorySpace.VMEM),    # similarity
        ),
    )(query.astype(jnp.float32), packed_params)

    # Batchwise path: selected prompts are batch-invariant; slice the top-k
    # rows of the rank-sorted full tile and keep the batch broadcast lazy.
    selected = sel_full[:top_k].reshape(top_k * L, embed_dim)
    selected_prompts = jnp.broadcast_to(selected[None], (B, top_k * L, embed_dim))

    prompt_mask = jnp.ones((B, top_k * L), dtype=jnp.bool_)
    return selected_prompts, prompt_mask, similarity


# -------------------- parameter init (deterministic, matches __init__) ------
def init_params(key, pool_size=POOL_SIZE, prompt_length=PROMPT_LENGTH,
                embed_dim=EMBED_DIM):
    k1, k2 = jax.random.split(key)
    # init_type='random' -> normal std=0.02
    prompt_pool = 0.02 * jax.random.normal(
        k1, (pool_size, prompt_length, embed_dim), dtype=jnp.float32)
    # prompt_key_init='uniform' -> uniform(-1, 1)
    prompt_key = jax.random.uniform(
        k2, (pool_size, embed_dim), minval=-1.0, maxval=1.0, dtype=jnp.float32)
    return prompt_pool, prompt_key


if __name__ == "__main__":
    key = jax.random.PRNGKey(0)
    k_param, k_query = jax.random.split(key)

    prompt_pool, prompt_key = init_params(k_param)
    packed_params = pack_prompt_params(prompt_pool, prompt_key)

    B = 2
    query = jax.random.normal(k_query, (B, EMBED_DIM), dtype=jnp.float32)

    selected_prompts, prompt_mask, similarity = prompt_pool_forward(
        query, packed_params, pool_size=POOL_SIZE, prompt_length=PROMPT_LENGTH,
        embed_dim=EMBED_DIM, top_k=TOP_K)
    jax.block_until_ready((selected_prompts, prompt_mask, similarity))

    # ---- sanity checks against a pure-JAX reference -------------------------
    qn = query / jnp.maximum(jnp.linalg.norm(query, axis=1, keepdims=True), EPS)
    kn = prompt_key / jnp.maximum(
        jnp.linalg.norm(prompt_key, axis=1, keepdims=True), EPS)
    sim_ref = qn @ kn.T
    # tolerance covers in-kernel rsqrt vs sqrt+divide in the reference
    assert jnp.allclose(similarity, sim_ref, atol=2e-3, rtol=2e-3), \
        "similarity mismatch"

    # top-k + gather consistency vs. the kernel's own similarity output
    _, idx_ref = jax.lax.top_k(similarity.mean(0), TOP_K)
    sel_ref = prompt_pool[idx_ref].reshape(TOP_K * PROMPT_LENGTH, EMBED_DIM)
    sel_ref = jnp.broadcast_to(sel_ref[None], selected_prompts.shape)
    assert jnp.allclose(selected_prompts, sel_ref, atol=3e-4, rtol=3e-3), \
        "gather mismatch"

    assert selected_prompts.shape == (B, TOP_K * PROMPT_LENGTH, EMBED_DIM)
    assert prompt_mask.shape == (B, TOP_K * PROMPT_LENGTH)
    assert prompt_mask.dtype == jnp.bool_

    print("KERNEL_OK")
</pallas_src>

<mosaic_0001>
module attributes {stable_mosaic.version = 11 : i64} {
  func.func @_prompt_pool_kernel(%arg0: memref<2x32xf32, #tpu.memory_space<vmem>>, %arg1: memref<40x128xf32, #tpu.memory_space<vmem>>, %arg2: memref<8x128xf32, #tpu.memory_space<vmem>>, %arg3: memref<2x8xf32, #tpu.memory_space<vmem>>) attributes {dimension_semantics = [], scalar_prefetch = 0 : i64, scratch_operands = 0 : i64, tpu.core_type = #tpu.core_type<tc>} {
    %c0 = arith.constant 0 : index
    %c0_0 = arith.constant 0 : index
    %0 = vector.load %arg0[%c0, %c0_0] : memref<2x32xf32, #tpu.memory_space<vmem>>, vector<2x32xf32>
    %c0_1 = arith.constant 0 : index
    %c0_2 = arith.constant 0 : index
    %1 = vector.load %arg1[%c0_1, %c0_2] : memref<40x128xf32, #tpu.memory_space<vmem>>, vector<32x8xf32>
    %c32 = arith.constant 32 : index
    %c0_3 = arith.constant 0 : index
    %2 = vector.load %arg1[%c32, %c0_3] : memref<40x128xf32, #tpu.memory_space<vmem>>, vector<8x128xf32>
    %3 = arith.mulf %0, %0 : vector<2x32xf32>
    %cst = arith.constant dense<0.000000e+00> : vector<2xf32>
    %4 = vector.multi_reduction <add>, %3, %cst [1] : vector<2x32xf32> to vector<2xf32>
    %5 = vector.shape_cast %4 : vector<2xf32> to vector<2x1xf32>
    %cst_4 = arith.constant 1.000000e-24 : f32
    %6 = vector.broadcast %cst_4 : f32 to vector<2x1xf32>
    %7 = arith.maximumf %5, %6 : vector<2x1xf32>
    %8 = math.rsqrt %7 : vector<2x1xf32>
    %9 = vector.broadcast %8 : vector<2x1xf32> to vector<2x32xf32>
    %10 = arith.mulf %0, %9 : vector<2x32xf32>
    %11 = arith.mulf %1, %1 : vector<32x8xf32>
    %cst_5 = arith.constant dense<0.000000e+00> : vector<8xf32>
    %12 = vector.multi_reduction <add>, %11, %cst_5 [0] : vector<32x8xf32> to vector<8xf32>
    %13 = vector.shape_cast %12 : vector<8xf32> to vector<1x8xf32>
    %cst_6 = arith.constant 1.000000e-24 : f32
    %14 = vector.broadcast %cst_6 : f32 to vector<1x8xf32>
    %15 = arith.maximumf %13, %14 : vector<1x8xf32>
    %16 = math.rsqrt %15 : vector<1x8xf32>
    %17 = vector.broadcast %16 : vector<1x8xf32> to vector<32x8xf32>
    %18 = arith.mulf %1, %17 : vector<32x8xf32>
    %cst_7 = arith.constant dense<0.000000e+00> : vector<2x8xf32>
    %19 = tpu.matmul %10, %18, %cst_7 {dimension_numbers = #tpu.dot_dimension_numbers<[1], [0], [0], [1], [0, 0, 1, 1], [], []>, precision = #tpu.contract_precision<fp32>} : vector<2x32xf32>, vector<32x8xf32>, vector<2x8xf32> -> vector<2x8xf32>
    %c0_8 = arith.constant 0 : index
    %c0_9 = arith.constant 0 : index
    %20 = vector.load %arg3[%c0_8, %c0_9] : memref<2x8xf32, #tpu.memory_space<vmem>>, vector<2x8xf32>
    tpu.vector_store %arg3[%c0_8, %c0_9], %19 {strides = array<i32>} : memref<2x8xf32, #tpu.memory_space<vmem>>, vector<2x8xf32>,
    %cst_10 = arith.constant dense<0.000000e+00> : vector<8xf32>
    %21 = vector.multi_reduction <add>, %19, %cst_10 [0] : vector<2x8xf32> to vector<8xf32>
    %22 = vector.shape_cast %21 : vector<8xf32> to vector<1x8xf32>
    %cst_11 = arith.constant 2.000000e+00 : f32
    %23 = vector.broadcast %cst_11 : f32 to vector<1x8xf32>
    %24 = arith.divf %22, %23 : vector<1x8xf32>
    %25 = tpu.iota {dimensions = array<i32: 0>} : vector<8x8xi32>
    %26 = tpu.iota {dimensions = array<i32: 1>} : vector<8x8xi32>
    %27 = arith.cmpi eq, %25, %26 : vector<8x8xi32>
    %cst_12 = arith.constant 0.000000e+00 : f32
    %28 = vector.shape_cast %24 : vector<1x8xf32> to vector<1x8xf32>
    %29 = vector.broadcast %28 : vector<1x8xf32> to vector<8x8xf32>
    %30 = vector.broadcast %cst_12 : f32 to vector<8x8xf32>
    %31 = arith.select %27, %29, %30 : vector<8x8xi1>, vector<8x8xf32>
    %cst_13 = arith.constant dense<0.000000e+00> : vector<8xf32>
    %32 = vector.multi_reduction <add>, %31, %cst_13 [1] : vector<8x8xf32> to vector<8xf32>
    %33 = vector.shape_cast %32 : vector<8xf32> to vector<8x1xf32>
    %34 = vector.broadcast %33 : vector<8x1xf32> to vector<8x8xf32>
    %35 = vector.broadcast %24 : vector<1x8xf32> to vector<8x8xf32>
    %36 = arith.cmpf ogt, %34, %35 : vector<8x8xf32>
    %37 = vector.broadcast %33 : vector<8x1xf32> to vector<8x8xf32>
    %38 = vector.broadcast %24 : vector<1x8xf32> to vector<8x8xf32>
    %39 = arith.cmpf oeq, %37, %38 : vector<8x8xf32>
    %40 = arith.cmpi slt, %25, %26 : vector<8x8xi32>
    %41 = arith.andi %39, %40 : vector<8x8xi1>
    %42 = arith.ori %36, %41 : vector<8x8xi1>
    %43 = arith.extui %42 : vector<8x8xi1> to vector<8x8xi32>
    %44 = arith.sitofp %43 : vector<8x8xi32> to vector<8x8xf32>
    %cst_14 = arith.constant dense<0.000000e+00> : vector<8xf32>
    %45 = vector.multi_reduction <add>, %44, %cst_14 [0] : vector<8x8xf32> to vector<8xf32>
    %46 = vector.shape_cast %45 : vector<8xf32> to vector<1x8xf32>
    %47 = arith.sitofp %25 : vector<8x8xi32> to vector<8x8xf32>
    %48 = vector.broadcast %46 : vector<1x8xf32> to vector<8x8xf32>
    %49 = arith.cmpf oeq, %47, %48 : vector<8x8xf32>
    %50 = arith.extui %49 : vector<8x8xi1> to vector<8x8xi32>
    %51 = arith.sitofp %50 : vector<8x8xi32> to vector<8x8xf32>
    %cst_15 = arith.constant dense<0.000000e+00> : vector<8x128xf32>
    %52 = tpu.matmul %51, %2, %cst_15 {dimension_numbers = #tpu.dot_dimension_numbers<[1], [0], [0], [1], [0, 0, 1, 1], [], []>, precision = #tpu.contract_precision<fp32>} : vector<8x8xf32>, vector<8x128xf32>, vector<8x128xf32> -> vector<8x128xf32>
    %c0_16 = arith.constant 0 : index
    %c0_17 = arith.constant 0 : index
    %53 = vector.load %arg2[%c0_16, %c0_17] : memref<8x128xf32, #tpu.memory_space<vmem>>, vector<8x128xf32>
    tpu.vector_store %arg2[%c0_16, %c0_17], %52 {strides = array<i32>} : memref<8x128xf32, #tpu.memory_space<vmem>>, vector<8x128xf32>,
    return
  }
}

</mosaic_0001>

<bundles_post_ra>
// kernel: tpu_custom_call.1
= control target key start
LH: loop header
LB: loop body
LE: loop exit
PB: predicated region body
PF: predicated region fallthrough
CT: control target
= control target key end

     0   :  { %9 = vsyncpa [#allocation3], 0  ;;  %s696_s0 = inlined_call_operand.hbm [shape: f32[2,32], index: 0, kind: input, shape index: {}]   ;;  %s697_s1 = inlined_call_operand.hbm [shape: f32[40,128], index: 1, kind: input, shape index: {}]   ;;  %s698_s2 = inlined_call_operand.hbm [shape: f32[8,128], index: 2, kind: output, shape index: {0}]   ;;  %s699_s3 = inlined_call_operand.hbm [shape: f32[2,8], index: 3, kind: output, shape index: {1}]  }
   0x1   :  { %10 = vsyncpa [#allocation6], 0 }
   0x2   :  { %11 = vsyncpa [#allocation4], 0 }
   0x3   :  { %12 = vsyncpa [#allocation9], 0  ;;  %s18_s14 = sshll.u32 %s696_s0, 4  ;;  %s641_s15 = smov [#allocation2]   ;;  %s19_s14 = int_to_ptr.hbm [resolvable:$true] %s18_s14 }
   0x4   :  { %s20_s16 = sshll.u32 %s641_s15, 4  ;;  %s28_s19 = sshll.u32 %s697_s1, 4  ;;  %s21_s16 = int_to_ptr.vmem [resolvable:$true] %s20_s16  ;;  %s29_s19 = int_to_ptr.hbm [resolvable:$true] %s28_s19 }
   0x5   :  { %23 = dma.hbm_to_vmem [thread:$0]  %s19_s14, 32, %s21_s16, [#allocation3]  }
   0x6   :  { %s642_s20 = smov [#allocation5]   ;;  %s643_s22 = smov 128  }
   0x7   :  { %s30_s21 = sshll.u32 %s642_s20, 4  ;;  %s644_s23 = smov 8   ;;  %s31_s21 = int_to_ptr.vmem [resolvable:$true] %s30_s21 }
   0x8   :  { %36 = dma.hbm_to_vmem [thread:$0]  %s29_s19, 640, %s31_s21, [#allocation6], %s643_s22, %s643_s22, %s644_s23  }
   0x9   :  { %633 = dma.done.wait [#allocation3], 32  }
   0xa   :  { %634 = vsyncadd [#allocation3], 4294967264 }
   0xb   :  { %635 = dma.done.wait [#allocation6], 640  }
   0xc   :  { %636 = vsyncadd [#allocation6], 4294966656  ;;  %v675_v0 = vld [vmem:[#allocation2] sm:$0x3]  ;;  %vm52_vm0 = vcmask 254976   ;;  %v46_v3 = vld [vmem:[#allocation5] sm:$0xff] }
   0xd   :  { %v51_v1 = vmul.f32 %v675_v0, %v675_v0  ;;  %v47_v4 = vld [vmem:[#allocation5 + $0x8] sm:$0xff]  ;;  %v68_v5 = vmul.f32 %v46_v3, %v46_v3  ;;  %v48_v7 = vld [vmem:[#allocation5 + $0x10] sm:$0xff]  ;;  %vm72_vm1 = vcmask 64512   ;;  %v49_v11 = vld [vmem:[#allocation5 + $0x18] sm:$0xff]  ;;  %vm101_vm8 = vcmask 261120   ;;  %s647_s0 = smov [#allocation8]  }
   0xe   :  { %v69_v6 = vmul.f32 %v47_v4, %v47_v4  ;;  %v70_v8 = vmul.f32 %v48_v7, %v48_v7  ;;  %v71_v13 = vmul.f32 %v49_v11, %v49_v11  ;;  %vm290_vm9 = vcmask 58368   ;;  %s500_s1 = sshll.u32 %s647_s0, 4  ;;  %s502_s26 = sshll.u32 %s699_s3, 4  ;;  %s501_s1 = int_to_ptr.vmem [resolvable:$true] %s500_s1  ;;  %s503_s26 = int_to_ptr.hbm [resolvable:$true] %s502_s26 }
   0xf   :  { %v53_v2 = vsel %vm52_vm0, %v51_v1, 0.0  ;;  %v73_v9 = vsel %vm72_vm1, %v68_v5, 0.0  ;;  %s648_s27 = smov [#allocation7]   ;;  %s491_s4 = sshll.u32 %s698_s2, 4  ;;  %s492_s4 = int_to_ptr.hbm [resolvable:$true] %s491_s4 }
  0x10   :  { %54 = vadd.xlane.f32.xlu0 %v53_v2  ;;  %v74_v10 = vsel %vm72_vm1, %v69_v6, 0.0  ;;  %v76_v14 = vsel %vm72_vm1, %v70_v8, 0.0  ;;  %v78_v16 = vsel %vm72_vm1, %v71_v13, 0.0  ;;  %s489_s28 = sshll.u32 %s648_s27, 4  ;;  %s490_s28 = int_to_ptr.vmem [resolvable:$true] %s489_s28 }
  0x11   :  { %v75_v12 = vadd.f32 %v74_v10, %v73_v9  ;;  %v645_v9 = vmov 2.0  }
  0x13   :  { %v77_v15 = vadd.f32 %v76_v14, %v75_v12 }
  0x15   :  { %v79_v17 = vadd.f32 %v78_v16, %v77_v15 }
  0x17   :  { %v80_v18 = vrot.slane %v79_v17, 4 }
  0x19   :  { %v81_v19 = vadd.f32 %v80_v18, %v79_v17 }
  0x1b   :  { %v82_v20 = vrot.slane %v81_v19, 2 }
  0x1d   :  { %v83_v21 = vadd.f32 %v82_v20, %v81_v19 }
  0x1f   :  { %v84_v22 = vrot.slane %v83_v21, 1 }
  0x21   :  { %v85_v23 = vadd.f32 %v84_v22, %v83_v21 }
  0x23   :  { %v86_v24 = vmax.f32 %v85_v23, 1e-24 }
  0x25   :  { %531 = vrsqrt.f32 %v86_v24  ;;  %vm93_vm2 = vweird.f32 %v86_v24 }
  0x2b   :  { %v532_v25 = vpop.eup %531 }
  0x2c   :  { %v88_v26 = vmul.f32 %v532_v25, %v86_v24  ;;  %vm94_vm3 = vweird.f32 %v532_v25 }
  0x2d   :  { %vm95_vm4 = vmor %vm93_vm2, %vm94_vm3 }
  0x2e   :  { %v89_v27 = vmul.f32 %v532_v25, %v88_v26 }
  0x30   :  { %v90_v28 = vmul.f32 0.5, %v89_v27  ;;  %v307_v27 = vlaneseq }
  0x32   :  { %v91_v29 = vsub.f32 1.5, %v90_v28 }
  0x34   :  { %v92_v30 = vmul.f32 %v532_v25, %v91_v29 }
  0x36   :  { %v96_v31 = vsel %vm95_vm4, %v532_v25, %v92_v30 }
  0x37   :  { %v100_v32 = vmul.f32 %v96_v31, %v49_v11  ;;  %v99_v34 = vmul.f32 %v96_v31, %v48_v7  ;;  %v98_v37 = vmul.f32 %v96_v31, %v47_v4  ;;  %v97_v41 = vmul.f32 %v96_v31, %v46_v3 }
  0x38   :  { %v308_v31 = vshrl.u32 %v307_v27, 7 }
  0x39   :  { %v117_v33 = vand.u32 4294901760, %v100_v32  ;;  %v119_v36 = vand.u32 4294901760, %v99_v34  ;;  %v121_v40 = vand.u32 4294901760, %v98_v37  ;;  %v123_v45 = vand.u32 4294901760, %v97_v41 }
  0x3b   :  { %v147_v35 = vsub.f32 %v100_v32, %v117_v33  ;;  %218 = vmatpush.msra.mxu3 %v117_v33  ;;  %118 = vmatpush.msra.mxu0 %v117_v33  ;;  %v153_v39 = vsub.f32 %v99_v34, %v119_v36  ;;  %v159_v44 = vsub.f32 %v98_v37, %v121_v40  ;;  %v310_v32 = vand.u32 127, %v307_v27 }
  0x3c   :  { %v165_v49 = vsub.f32 %v97_v41, %v123_v45 }
  0x3d   :  { %v148_v38 = vand.u32 4294901760, %v147_v35  ;;  %189 = vmatpush.msra.mxu2 %v147_v35  ;;  %220 = vmatpush.msra.mxu3 %v119_v36  ;;  %v154_v43 = vand.u32 4294901760, %v153_v39  ;;  %v160_v48 = vand.u32 4294901760, %v159_v44  ;;  %vm311_vm11 = vcmp.eq.s32.totalorder %v308_v31, %v310_v32 }
  0x3e   :  { %120 = vmatpush.msra.mxu0 %v119_v36  ;;  %v166_v52 = vand.u32 4294901760, %v165_v49  ;;  %vm318_vm12 = vcmp.lt.s32.totalorder %v308_v31, %v310_v32 }
  0x3f   :  { %v149_v42 = vsub.f32 %v147_v35, %v148_v38  ;;  %192 = vmatpush.msra.mxu2 %v153_v39  ;;  %222 = vmatpush.msra.mxu3 %v121_v40  ;;  %v155_v47 = vsub.f32 %v153_v39, %v154_v43  ;;  %v161_v51 = vsub.f32 %v159_v44, %v160_v48  ;;  %v50_v39 = vld [vmem:[#allocation5 + $0x20] sm:$0xff] }
  0x40   :  { %122 = vmatpush.msra.mxu0 %v121_v40  ;;  %v167_v54 = vsub.f32 %v165_v49, %v166_v52 }
  0x41   :  { %v150_v46 = vand.u32 4294901760, %v149_v42  ;;  %195 = vmatpush.msra.mxu2 %v159_v44  ;;  %224 = vmatpush.msra.mxu3 %v123_v45  ;;  %v156_v50 = vand.u32 4294901760, %v155_v47  ;;  %v162_v53 = vand.u32 4294901760, %v161_v51 }
  0x42   :  { %124 = vmatpush.msra.mxu0 %v123_v45  ;;  %v168_v55 = vand.u32 4294901760, %v167_v54  ;;  %v330_v54 = vcvt.s32.f32 %v308_v31 }
  0x43   :  { %151 = vmatpush.msra.mxu1 %v150_v46  ;;  %198 = vmatpush.msra.mxu2 %v165_v49  ;;  %v646_v46 = vmov 0.0  }
  0x44   :  { %247 = vmatpush.msrb.mxu0 %v148_v38 }
  0x45   :  { %157 = vmatpush.msra.mxu1 %v156_v50 }
  0x46   :  { %251 = vmatpush.msrb.mxu0 %v154_v43 }
  0x47   :  { %163 = vmatpush.msra.mxu1 %v162_v53 }
  0x48   :  { %255 = vmatpush.msrb.mxu0 %v160_v48 }
  0x49   :  { %169 = vmatpush.msra.mxu1 %v168_v55 }
  0x4a   :  { %259 = vmatpush.msrb.mxu0 %v166_v52 }
  0x4b   :  { %278 = vmatpush.msrb.mxu1 %v117_v33 }
  0x4d   :  { %280 = vmatpush.msrb.mxu1 %v119_v36 }
  0x4f   :  { %282 = vmatpush.msrb.mxu1 %v121_v40  ;;  %v352_v40 = vand.u32 4294901760, %v50_v39 }
  0x51   :  { %284 = vmatpush.msrb.mxu1 %v123_v45  ;;  %v379_v41 = vsub.f32 %v50_v39, %v352_v40  ;;  %353 = vmatpush.msrb.mxu2 %v352_v40 }
  0x53   :  { %v380_v42 = vand.u32 4294901760, %v379_v41 }
  0x55   :  { %v381_v43 = vsub.f32 %v379_v41, %v380_v42 }
  0x57   :  { %v382_v44 = vand.u32 4294901760, %v381_v43 }
  0x59   :  { %383 = vmatpush.msrb.mxu3 %v382_v44 }
  0x83   :  { %v55_v56 = vpop.xlane.xlu0 %54 }
  0x84   :  { %v56_v57 = vmax.f32 %v55_v56, 1e-24 }
  0x86   :  { %533 = vrsqrt.f32 %v56_v57  ;;  %vm63_vm6 = vweird.f32 %v56_v57 }
  0x87   :  { %535 = vrcp.f32 %v645_v9 }
  0x8c   :  { %v534_v58 = vpop.eup %533 }
  0x8d   :  { %v58_v59 = vmul.f32 %v534_v58, %v56_v57  ;;  %vm64_vm5 = vweird.f32 %v534_v58 }
  0x8e   :  { %vm65_vm7 = vmor %vm63_vm6, %vm64_vm5 }
  0x8f   :  { %v59_v60 = vmul.f32 %v534_v58, %v58_v59 }
  0x91   :  { %v60_v61 = vmul.f32 0.5, %v59_v60 }
  0x93   :  { %v61_v62 = vsub.f32 1.5, %v60_v61 }
  0x95   :  { %v62_v63 = vmul.f32 %v534_v58, %v61_v62 }
  0x97   :  { %v66_v1 = vsel %vm65_vm7, %v534_v58, %v62_v63 }
  0x98   :  { %v67_v2 = vmul.f32 %v66_v1, %v675_v0  ;;  %v536_v0 = vpop.eup %535 }
  0x99   :  { %v300_v17 = vmul.f32 2.0, %v536_v0  ;;  %vm304_vm10 = vweird.f32 %v536_v0 }
  0x9a   :  { %v103_v3 = vsel %vm101_vm8, %v67_v2, 0 }
  0x9b   :  { %v125_v4 = vand.u32 4294901760, %v103_v3  ;;  %v301_v22 = vsub.f32 1.0, %v300_v17 }
  0x9d   :  { %171 = vmatmul.f32.vlgmr.msra.gmra.mxu1 %v125_v4  ;;  %v126_v5 = vsub.f32 %v103_v3, %v125_v4  ;;  %v302_v25 = vmul.f32 %v536_v0, %v301_v22 }
  0x9e   :  { %429 = vmatpush.msra.mxu1 %v352_v40 }
  0x9f   :  { %201 = vmatmul.f32.vlgmr.msra.gmra.mxu2 %v126_v5  ;;  %v127_v6 = vand.u32 4294901760, %v126_v5  ;;  %v303_v29 = vadd.f32 %v536_v0, %v302_v25 }
  0xa0   :  { %455 = vmatpush.msra.mxu2 %v380_v42 }
  0xa1   :  { %228 = vmatmul.f32.vlgmr.msra.gmra.mxu3 %v127_v6  ;;  %v128_v7 = vsub.f32 %v126_v5, %v127_v6  ;;  %v305_v34 = vsel %vm304_vm10, %v536_v0, %v303_v29 }
  0xa2   :  { %477 = vmatpush.msra.mxu3 %v352_v40 }
  0xa3   :  { %v129_v8 = vand.u32 4294901760, %v128_v7 }
  0xa5   :  { %130 = vmatmul.f32.vlgmr.msra.gmra.mxu0 %v129_v8  ;;  %286 = vmatmul.f32.vlgmr.msrb.gmra.mxu1 %v125_v4 }
  0xa6   :  { %406 = vmatpush.msra.mxu0 %v379_v41 }
  0xad   :  { %261 = vmatmul.f32.vlgmr.msrb.gmra.mxu0 %v125_v4 }
 0x11a   :  { %v172_v10 = vpop.f32.mrf.mxu1 }
 0x122   :  { %v131_v11 = vpop.f32.mrf.mxu0  ;;  %v202_v13 = vpop.f32.mrf.mxu2 }
 0x123   :  { %v173_v12 = vadd.f32 %v172_v10, %v131_v11  ;;  %v287_v20 = vpop.f32.mrf.mxu1 }
 0x124   :  { %v229_v15 = vpop.f32.mrf.mxu3 }
 0x125   :  { %v203_v14 = vadd.f32 %v202_v13, %v173_v12 }
 0x127   :  { %v230_v16 = vadd.f32 %v229_v15, %v203_v14 }
 0x12a   :  { %v262_v18 = vpop.f32.mrf.mxu0 }
 0x12b   :  { %v263_v19 = vadd.f32 %v262_v18, %v230_v16 }
 0x12d   :  { %v288_v21 = vadd.f32 %v287_v20, %v263_v19 }
 0x12f   :  { %v292_v23 = vsel %vm290_vm9, %v288_v21, 0.0  ;;  %291 = vst.msk [vmem:[#allocation8] sm:$0x3] %vm290_vm9, %v288_v21 }
 0x130   :  { %v293_v24 = vrot.slane %v292_v23, 4  ;;  %505 = dma.vmem_to_hbm [thread:$0]  %s501_s1, 32, %s503_s26, [#allocation9]  }
 0x132   :  { %v294_v26 = vadd.f32 %v293_v24, %v292_v23 }
 0x134   :  { %v295_v28 = vrot.slane %v294_v26, 2 }
 0x136   :  { %v296_v30 = vadd.f32 %v295_v28, %v294_v26 }
 0x138   :  { %v297_v33 = vrot.slane %v296_v30, 1 }
 0x13a   :  { %v298_v35 = vadd.f32 %v297_v33, %v296_v30 }
 0x13c   :  { %v306_v36 = vmul.f32 %v305_v34, %v298_v35 }
 0x13e   :  { %v312_v37 = vsel %vm311_vm11, %v306_v36, 0.0 }
 0x13f   :  { %v313_v38 = vsel %vm72_vm1, %v312_v37, 0.0 }
 0x140   :  { %314 = vadd.xlane.f32.xlu0 %v313_v38 }
 0x1b3   :  { %v315_v45 = vpop.xlane.xlu0 %314 }
 0x1b4   :  { %vm316_vm13 = vcmp.gt.f32.partialorder %v315_v45, %v306_v36  ;;  %vm317_vm14 = vcmp.eq.f32.partialorder %v315_v45, %v306_v36 }
 0x1b5   :  { %vm319_vm15 = vmand %vm317_vm14, %vm318_vm12 }
 0x1b6   :  { %vm320_vm0 = vmor %vm316_vm13, %vm319_vm15 }
 0x1b7   :  { %v518_v47 = vsel %vm320_vm0, 1.0, %v646_v46 }
 0x1b8   :  { %v323_v48 = vsel %vm72_vm1, %v518_v47, 0.0 }
 0x1b9   :  { %v324_v49 = vrot.slane %v323_v48, 4 }
 0x1bb   :  { %v325_v50 = vadd.f32 %v324_v49, %v323_v48 }
 0x1bd   :  { %v326_v51 = vrot.slane %v325_v50, 2 }
 0x1bf   :  { %v327_v52 = vadd.f32 %v326_v51, %v325_v50 }
 0x1c1   :  { %v328_v53 = vrot.slane %v327_v52, 1 }
 0x1c3   :  { %v329_v55 = vadd.f32 %v328_v53, %v327_v52 }
 0x1c5   :  { %vm331_vm2 = vcmp.eq.f32.partialorder %v330_v54, %v329_v55 }
 0x1c6   :  { %v519_v56 = vsel %vm331_vm2, 1.0, %v646_v46 }
 0x1c7   :  { %v335_v57 = vsel %vm72_vm1, %v519_v56, 0  ;;  %520 = vmatmul.msk.f32.vlgmr.msrb.gmra.mxu3 %vm72_vm1, %v519_v56 }
 0x1c8   :  { %v355_v58 = vsub.f32 %v335_v57, %v335_v57 }
 0x1ca   :  { %409 = vmatmul.f32.vlgmr.msra.gmra.mxu0 %v355_v58  ;;  %v356_v59 = vand.u32 4294901760, %v355_v58 }
 0x1cc   :  { %433 = vmatmul.f32.vlgmr.msra.gmra.mxu1 %v356_v59  ;;  %v357_v60 = vsub.f32 %v355_v58, %v356_v59 }
 0x1ce   :  { %v358_v61 = vand.u32 4294901760, %v357_v60 }
 0x1cf   :  { %522 = vmatmul.msk.f32.vlgmr.msra.gmra.mxu3 %vm72_vm1, %v519_v56 }
 0x1d0   :  { %359 = vmatmul.f32.vlgmr.msrb.gmra.mxu2 %v358_v61 }
 0x1d8   :  { %521 = vmatmul.msk.f32.vlgmr.msra.gmra.mxu2 %vm72_vm1, %v519_v56 }
 0x247   :  { %v410_v2 = vpop.f32.mrf.mxu0 }
 0x249   :  { %v434_v4 = vpop.f32.mrf.mxu1 }
 0x24a   :  { %v386_v62 = vpop.f32.mrf.mxu3 }
 0x252   :  { %v480_v8 = vpop.f32.mrf.mxu3 }
 0x253   :  { %v360_v63 = vpop.f32.mrf.mxu2 }
 0x254   :  { %v387_v1 = vadd.f32 %v386_v62, %v360_v63 }
 0x256   :  { %v411_v3 = vadd.f32 %v410_v2, %v387_v1 }
 0x258   :  { %v435_v5 = vadd.f32 %v434_v4, %v411_v3 }
 0x25b   :  { %v458_v6 = vpop.f32.mrf.mxu2 }
 0x25c   :  { %v459_v7 = vadd.f32 %v458_v6, %v435_v5 }
 0x25e   :  { %v481_v9 = vadd.f32 %v480_v8, %v459_v7 }
 0x260   :  { %483 = vst [vmem:[#allocation7] sm:$0xff] %v481_v9 }
 0x261   :  { %494 = dma.vmem_to_hbm [thread:$0]  %s490_s28, 128, %s492_s4, [#allocation4]  }
 0x262   :  { %637 = dma.done.wait [#allocation4], 128  }
 0x263   :  { %638 = vsyncadd [#allocation4], 4294967168 }
 0x264   :  { %639 = dma.done.wait [#allocation9], 32  }
 0x265   :  { %640 = vsyncadd [#allocation9], 4294967264 }
 0x266   :  { %514 = vsyncpa [#allocation3], 1 }
 0x267   :  { %515 = vsyncpa [#allocation6], 1 }
 0x268   :  { %516 = vsyncpa [#allocation4], 1 }
 0x269   :  { %517 = vsyncpa [#allocation9], 1 }

</bundles_post_ra>
